<compile_context>
chip_gen: v7x
topology: tpu7x:2x2x1
jax: 0.10.0
libtpu: 0.0.40
codegen_flags: <defaults>
</compile_context>

<pallas_src>
import functools

import jax
import jax.numpy as jnp
from jax import lax
from jax.experimental import pallas as pl
from jax.experimental.pallas import tpu as pltpu

NEG = -1e9       # large finite negative for padded tag lanes (avoids inf/NaN)
TINY = 1e-30     # log(q + TINY) keeps padded lanes finite
B_TILE = 8       # batch rows per CRF grid step (one sublane group / vreg row)
CHUNK = 16       # next-tag lanes per Viterbi inner chunk (bounds live vregs)


def _round_up(x, m):
    return ((x + m - 1) // m) * m


# ----------------------------------------------------------------------------
# Kernel 1: Linear projection  rows(B*T) @ (D, NT_pad) + b_pad   (bf16 -> f32)
# ----------------------------------------------------------------------------
def linear_kernel(h_ref, w_ref, b_ref, o_ref):
    o_ref[...] = (
        jnp.dot(h_ref[...], w_ref[...], preferred_element_type=jnp.float32)
        + b_ref[...]
    )


def linear_pallas(h2d, w_pad, b_pad, *, tile_m=1024):
    """h2d: (M, D) bf16, w_pad: (D, NTP) bf16, b_pad: (1, NTP) f32 -> (M, NTP) f32."""
    M, D = h2d.shape
    NTP = w_pad.shape[1]

    tile_m = int(min(tile_m, _round_up(M, 16)))
    tile_m = _round_up(max(tile_m, 16), 16)        # bf16 sublane packing: x16

    # Only pad rows in the (rare) case the block would exceed the array.
    M_run = max(M, tile_m)
    if M_run != M:
        h2d = jnp.pad(h2d, ((0, M_run - M), (0, 0)))
    grid = (pl.cdiv(M_run, tile_m),)

    vmem_need = (2 * tile_m * D * 2            # h blocks (double buffered, bf16)
                 + 2 * D * NTP * 2             # W (bf16)
                 + 2 * tile_m * NTP * 4        # out blocks (f32)
                 + 2 * NTP * 4 + (1 << 20))
    vmem_limit = int(min(max(2 * vmem_need, 8 << 20), 40 << 20))

    out = pl.pallas_call(
        linear_kernel,
        out_shape=jax.ShapeDtypeStruct((M_run, NTP), jnp.float32),
        grid=grid,
        in_specs=[
            pl.BlockSpec((tile_m, D), lambda i: (i, 0)),
            pl.BlockSpec((D, NTP), lambda i: (0, 0)),
            pl.BlockSpec((1, NTP), lambda i: (0, 0)),
        ],
        out_specs=pl.BlockSpec((tile_m, NTP), lambda i: (i, 0)),
        compiler_params=pltpu.CompilerParams(
            dimension_semantics=("parallel",),
            vmem_limit_bytes=vmem_limit,
        ),
        cost_estimate=pl.CostEstimate(
            flops=2 * M * D * NTP,
            transcendentals=0,
            bytes_accessed=2 * M * D + 2 * D * NTP + 4 * M * NTP + 4 * NTP,
        ),
    )(h2d, w_pad, b_pad)
    return out[:M] if M_run != M else out


# ----------------------------------------------------------------------------
# Kernel 2: CRF forward (log-partition, MXU form), gold score, Viterbi + trace.
# logits are time-major (T, B_pad, NTP); one batch tile of B_TILE rows per step.
# ----------------------------------------------------------------------------
def crf_kernel(tmax_ref,                                        # scalar prefetch
               logits_ref, lens_ref, labels_ref, gtr_ref,
               start_ref, end_ref, transT_ref, exp_trans_ref,
               tags_ref, llh_ref,
               hist_ref, vidx_ref, vmax_ref, vit_ref,
               alpha_ref, num_ref, lastlbl_ref,
               *, compute_llh):
    T, Bt, NTP = logits_ref.shape
    f32 = jnp.float32
    n_chunks = NTP // CHUNK

    t_hi = jnp.minimum(tmax_ref[pl.program_id(0)], T)           # serial trip count

    start = start_ref[...]                                      # (1, NTP)
    end = end_ref[...]                                          # (1, NTP)
    lens_vec = lens_ref[...]                                    # (Bt, 1) i32

    # hoisted iotas (JAX does not CSE broadcast_in_dim inside loops)
    iota_lane = lax.broadcasted_iota(jnp.int32, (1, NTP), 1)
    iota_prev = lax.broadcasted_iota(jnp.int32, (1, 1, NTP), 2)

    # ---- t = 0 -------------------------------------------------------------
    init = start + logits_ref[0]                                # (Bt, NTP)
    vit_ref[...] = init
    tags_ref[...] = jnp.zeros(tags_ref.shape, jnp.int32)        # zero-pad tail
    if compute_llh:
        alpha_ref[...] = init
        lbl0 = labels_ref[0]                                    # (Bt, 1)
        oh0 = (iota_lane == lbl0).astype(f32)
        num_ref[...] = jnp.sum(oh0 * init, axis=-1, keepdims=True)
        lastlbl_ref[...] = lbl0

    # ---- forward recursion + Viterbi, t = 1 .. t_hi-1 ------------------------
    def step(t, carry):
        et = logits_ref[t]                                      # (Bt, NTP)
        keep = t < lens_vec                                     # (Bt, 1) bool

        if compute_llh:
            # log-partition recursion on the MXU:
            #   alpha'_j = m + log( sum_i exp(alpha_i - m) * exp(trans[i, j]) ) + e_j
            alpha = alpha_ref[...]
            m = jnp.max(alpha, axis=-1, keepdims=True)
            p = jnp.exp(alpha - m)
            q = jnp.dot(p, exp_trans_ref[...],
                        preferred_element_type=f32)             # (Bt, NTP)

        # Viterbi max / first-occurrence argmax over previous tag, chunked
        # along the next-tag axis so the live 3D tensor stays small.
        vit = vit_ref[...]
        for c in range(n_chunks):
            lo = c * CHUNK
            tT = transT_ref[lo:lo + CHUNK, :]                   # (CHUNK, NTP)
            v3 = vit[:, None, :] + tT[None, :, :]               # (Bt, CHUNK, NTP)
            vmax_c = jnp.max(v3, axis=-1)
            vidx_c = jnp.min(
                jnp.where(v3 == vmax_c[..., None], iota_prev, NTP), axis=-1)
            vmax_ref[:, lo:lo + CHUNK] = vmax_c
            vidx_ref[:, lo:lo + CHUNK] = vidx_c
        hist_ref[t] = vidx_ref[...]                             # backpointers
        vit_ref[...] = jnp.where(keep, vmax_ref[...] + et, vit)

        if compute_llh:
            lse = m + jnp.log(q + TINY)
            alpha_ref[...] = jnp.where(keep, lse + et, alpha)
            # gold-path score (transition part precomputed exactly in wrapper)
            lbl_t = labels_ref[t]                               # (Bt, 1)
            oh = (iota_lane == lbl_t).astype(f32)
            emit = jnp.sum(oh * et, axis=-1, keepdims=True)
            num_ref[...] = num_ref[...] + keep.astype(f32) * (gtr_ref[t] + emit)
            lastlbl_ref[...] = jnp.where(keep, lbl_t, lastlbl_ref[...])
        return carry

    lax.fori_loop(1, t_hi, step, 0)

    # ---- log-likelihood ------------------------------------------------------
    if compute_llh:
        x = alpha_ref[...] + end
        mx = jnp.max(x, axis=-1, keepdims=True)
        denom = mx + jnp.log(jnp.sum(jnp.exp(x - mx), axis=-1, keepdims=True))
        oh_last = (iota_lane == lastlbl_ref[...]).astype(f32)
        num = num_ref[...] + jnp.sum(oh_last * end, axis=-1, keepdims=True)
        llh_ref[...] = num - denom
    else:
        llh_ref[...] = jnp.zeros(llh_ref.shape, jnp.float32)

    # ---- Viterbi backtrace ---------------------------------------------------
    final = vit_ref[...] + end
    mf = jnp.max(final, axis=-1, keepdims=True)
    best_last = jnp.min(jnp.where(final == mf, iota_lane, NTP),
                        axis=-1, keepdims=True)                  # (Bt, 1) i32
    seq_end = lens_vec - 1                                        # (Bt, 1) i32

    def bt_step(r, cur):
        t = t_hi - 1 - r
        hist_next = hist_ref[jnp.minimum(t + 1, T - 1)]          # (Bt, NTP)
        back = jnp.sum(hist_next * (iota_lane == cur).astype(jnp.int32),
                       axis=-1, keepdims=True)
        new_cur = jnp.where(seq_end == t, best_last,
                            jnp.where(seq_end > t, back, jnp.zeros_like(cur)))
        tags_ref[t] = new_cur
        return new_cur

    lax.fori_loop(0, t_hi, bt_step, jnp.zeros((Bt, 1), jnp.int32))


def crf_pallas(tmax, logits_tb, lens_col, labels_tb, gtr_tb,
               start_pad, end_pad, transT_pad, exp_trans_pad, *, compute_llh):
    T, B_pad, NTP = logits_tb.shape
    assert B_pad % B_TILE == 0
    grid = (B_pad // B_TILE,)

    # VMEM budget (lane-padded): logits/labels/gtr/tags blocks + hist scratch.
    lane = 128
    per_t = 4 * B_TILE * (2 * NTP + 3 * 2 * lane + NTP)
    fixed = 4 * (4 * NTP + 4 * NTP * NTP + 4 * B_TILE * NTP + 16 * B_TILE) + (2 << 20)
    vmem_limit = int(min(max(int(1.25 * (per_t * T + fixed)), 8 << 20), 40 << 20))
    # TODO(synk): for very long T, split the time axis (carry alpha/vit across
    # grid steps) and store backpointers as int16 to halve the hist scratch.

    kernel = functools.partial(crf_kernel, compute_llh=compute_llh)

    tags, llh = pl.pallas_call(
        kernel,
        out_shape=(
            jax.ShapeDtypeStruct((T, B_pad, 1), jnp.int32),
            jax.ShapeDtypeStruct((B_pad, 1), jnp.float32),
        ),
        grid_spec=pltpu.PrefetchScalarGridSpec(
            num_scalar_prefetch=1,
            grid=grid,
            in_specs=[
                pl.BlockSpec((T, B_TILE, NTP), lambda b, tm: (0, b, 0)),
                pl.BlockSpec((B_TILE, 1), lambda b, tm: (b, 0)),
                pl.BlockSpec((T, B_TILE, 1), lambda b, tm: (0, b, 0)),
                pl.BlockSpec((T, B_TILE, 1), lambda b, tm: (0, b, 0)),
                pl.BlockSpec((1, NTP), lambda b, tm: (0, 0)),
                pl.BlockSpec((1, NTP), lambda b, tm: (0, 0)),
                pl.BlockSpec((NTP, NTP), lambda b, tm: (0, 0)),
                pl.BlockSpec((NTP, NTP), lambda b, tm: (0, 0)),
            ],
            out_specs=(
                pl.BlockSpec((T, B_TILE, 1), lambda b, tm: (0, b, 0)),
                pl.BlockSpec((B_TILE, 1), lambda b, tm: (b, 0)),
            ),
            scratch_shapes=[
                pltpu.VMEM((T, B_TILE, NTP), jnp.int32),   # backpointers
                pltpu.VMEM((B_TILE, NTP), jnp.int32),      # per-step argmax assembly
                pltpu.VMEM((B_TILE, NTP), jnp.float32),    # per-step max assembly
                pltpu.VMEM((B_TILE, NTP), jnp.float32),    # Viterbi scores
                pltpu.VMEM((B_TILE, NTP), jnp.float32),    # log-partition scores
                pltpu.VMEM((B_TILE, 1), jnp.float32),      # gold-path numerator
                pltpu.VMEM((B_TILE, 1), jnp.int32),        # last valid gold label
            ],
        ),
        compiler_params=pltpu.CompilerParams(
            dimension_semantics=("parallel",),
            vmem_limit_bytes=vmem_limit,
        ),
        cost_estimate=pl.CostEstimate(
            flops=8 * B_pad * T * NTP * NTP,
            transcendentals=2 * B_pad * T * NTP,
            bytes_accessed=4 * (T * B_pad * NTP + 6 * T * B_pad
                                + 2 * NTP * NTP + 2 * NTP + 3 * B_pad),
        ),
    )(tmax, logits_tb, lens_col, labels_tb, gtr_tb,
      start_pad, end_pad, transT_pad, exp_trans_pad)
    return tags, llh


# ----------------------------------------------------------------------------
# Wrapper glue (padding / layout plumbing in plain JAX)
# ----------------------------------------------------------------------------
def _pad_crf_params(params, NTP):
    NT = params["trans"].shape[0]
    trans = params["trans"].astype(jnp.float32)
    start_pad = jnp.full((1, NTP), NEG, jnp.float32).at[:, :NT].set(
        params["start"].reshape(1, NT))
    end_pad = jnp.zeros((1, NTP), jnp.float32).at[:, :NT].set(
        params["end"].reshape(1, NT))
    transT_pad = jnp.zeros((NTP, NTP), jnp.float32).at[:NT, :NT].set(trans.T)
    exp_trans_pad = jnp.zeros((NTP, NTP), jnp.float32).at[:NT, :NT].set(
        jnp.exp(trans))
    return start_pad, end_pad, transT_pad, exp_trans_pad


def bert_rnn_crf_decoder_forward(params, hiddens, mask, labels=None, *, tile_m=1024):
    B, T, D = hiddens.shape
    NT = params["trans"].shape[0]
    NTP = _round_up(max(NT, 128), 128)
    B_pad = _round_up(B, B_TILE)
    compute_llh = labels is not None

    # ---- Linear: bf16 inputs, f32 accumulate, lane-padded logits -------------
    # (pad W columns with 0 and bias with NEG so padded tag lanes get logit=NEG;
    #  in a full model the bf16 cast fuses with the encoder producing hiddens.)
    w_pad = jnp.zeros((D, NTP), jnp.float32).at[:, :NT].set(params["w"])
    b_pad = jnp.full((1, NTP), NEG, jnp.float32).at[:, :NT].set(
        params["b"].reshape(1, NT))
    h2d = hiddens.reshape(B * T, D).astype(jnp.bfloat16)
    logits2d = linear_pallas(h2d, w_pad.astype(jnp.bfloat16), b_pad, tile_m=tile_m)

    # Layout plumbing for the CRF: time-major, batch padded to B_pad.
    # TODO(synk): fold this transpose/pad into the linear out_spec (grid over
    # (batch, time) tiles + in-kernel (b,t) transpose) to remove this XLA copy.
    logits_tb = jnp.transpose(logits2d.reshape(B, T, NTP), (1, 0, 2))
    if B_pad != B:
        logits_tb = jnp.pad(logits_tb, ((0, 0), (0, B_pad - B), (0, 0)))

    start_pad, end_pad, transT_pad, exp_trans_pad = _pad_crf_params(params, NTP)

    lens = jnp.sum(mask.astype(jnp.int32), axis=1)                       # (B,)
    lens_pad = jnp.pad(lens, (0, B_pad - B)).astype(jnp.int32)           # (B_pad,)
    tmax = jnp.max(lens_pad.reshape(B_pad // B_TILE, B_TILE), axis=1).astype(jnp.int32)
    lens_col = lens_pad.reshape(B_pad, 1)

    if compute_llh:
        lbl = labels.astype(jnp.int32)
        # exact gold transition scores trans[y_{t-1}, y_t] (t=0 entry unused)
        gt = params["trans"][lbl[:, :-1], lbl[:, 1:]]                    # (B, T-1)
        gold_tr = jnp.concatenate([jnp.zeros((B, 1), jnp.float32), gt], axis=1)
    else:
        lbl = jnp.zeros((B, T), jnp.int32)
        gold_tr = jnp.zeros((B, T), jnp.float32)
    labels_tb = jnp.pad(lbl, ((0, B_pad - B), (0, 0))).T.reshape(T, B_pad, 1)
    gtr_tb = jnp.pad(gold_tr, ((0, B_pad - B), (0, 0))).T.reshape(T, B_pad, 1)

    tags_tb, llh = crf_pallas(tmax, logits_tb, lens_col, labels_tb, gtr_tb,
                              start_pad, end_pad, transT_pad, exp_trans_pad,
                              compute_llh=compute_llh)

    # dense (B, T) int32, zero-padded past each sequence length (callers must
    # trim by mask/length -- tag id 0 is also a valid tag).
    pred = jnp.transpose(tags_tb.reshape(T, B_pad)[:, :B])
    if compute_llh:
        loss = -jnp.mean(llh[:B, 0])          # torchcrf reduction='mean', negated
        return pred, loss
    return (pred,)


# ----------------------------------------------------------------------------
# Pure-JAX reference (torchcrf semantics)
# ----------------------------------------------------------------------------
def _crf_reference(logits, mask, labels, start, end, trans):
    B, T, NT = logits.shape
    transT = trans.T
    iota = jnp.arange(NT)[None, :]

    e0 = logits[:, 0, :]
    alpha = start + e0
    vit = start + e0
    oh_prev = (iota == labels[:, 0:1]).astype(jnp.float32)
    last_oh = oh_prev
    num = jnp.sum(oh_prev * alpha, axis=-1, keepdims=True)
    history = []
    for t in range(1, T):
        et = logits[:, t, :]
        mt = mask[:, t:t + 1]
        keep = mt > 0.5

        s3 = alpha[:, None, :] + transT[None, :, :]
        m = jnp.max(s3, axis=-1)
        lse = m + jnp.log(jnp.sum(jnp.exp(s3 - m[..., None]), axis=-1))
        alpha = jnp.where(keep, lse + et, alpha)

        v3 = vit[:, None, :] + transT[None, :, :]
        vmax = jnp.max(v3, axis=-1)
        vidx = jnp.min(jnp.where(v3 == vmax[..., None],
                                 jnp.arange(NT)[None, None, :], NT), axis=-1)
        history.append(vidx)
        vit = jnp.where(keep, vmax + et, vit)

        oh_cur = (iota == labels[:, t:t + 1]).astype(jnp.float32)
        trans_sc = trans[labels[:, t - 1], labels[:, t]][:, None]
        emit_sc = jnp.sum(oh_cur * et, axis=-1, keepdims=True)
        num = num + mt * (trans_sc + emit_sc)
        last_oh = jnp.where(keep, oh_cur, last_oh)

    x = alpha + end
    mx = jnp.max(x, axis=-1, keepdims=True)
    denom = mx + jnp.log(jnp.sum(jnp.exp(x - mx), axis=-1, keepdims=True))
    num = num + jnp.sum(last_oh * end, axis=-1, keepdims=True)
    llh = num - denom

    final = vit + end
    mf = jnp.max(final, axis=-1, keepdims=True)
    best_last = jnp.min(jnp.where(final == mf, iota, NT), axis=-1, keepdims=True)
    seq_end = jnp.sum(mask, axis=1, keepdims=True).astype(jnp.int32) - 1

    cur = jnp.zeros((B, 1), jnp.int32)
    cols = [None] * T
    for t in range(T - 1, -1, -1):
        if t == T - 1:
            back = jnp.zeros((B, 1), jnp.int32)
        else:
            back = jnp.sum(history[t] * (iota == cur).astype(jnp.int32),
                           axis=-1, keepdims=True)
        cur = jnp.where(seq_end == t, best_last,
                        jnp.where(seq_end > t, back, jnp.zeros((B, 1), jnp.int32)))
        cols[t] = cur
    tags = jnp.concatenate(cols, axis=1)
    return tags, llh


if __name__ == "__main__":
    B, T, D, NT = 4, 8, 32, 8   # batch, seq, num_dims, num_tags

    key = jax.random.PRNGKey(0)
    k_h, k_w, k_b, k_s, k_e, k_t, k_lbl = jax.random.split(key, 7)

    bound = 1.0 / (D ** 0.5)
    params = {
        "w": jax.random.uniform(k_w, (D, NT), jnp.float32, -bound, bound),
        "b": jax.random.uniform(k_b, (1, NT), jnp.float32, -bound, bound),
        "start": jax.random.uniform(k_s, (1, NT), jnp.float32, -0.1, 0.1),
        "end": jax.random.uniform(k_e, (1, NT), jnp.float32, -0.1, 0.1),
        "trans": jax.random.uniform(k_t, (NT, NT), jnp.float32, -0.1, 0.1),
    }

    hiddens = jax.random.normal(k_h, (B, T, D), jnp.float32)
    lengths = jnp.array([T, T - 3, T, 3], jnp.int32)
    mask = (jnp.arange(T)[None, :] < lengths[:, None]).astype(jnp.float32)
    labels = jax.random.randint(k_lbl, (B, T), 0, NT, jnp.int32)

    # training path (pred + loss); tile_m=16 keeps the linear grid small but real
    pred, loss = bert_rnn_crf_decoder_forward(params, hiddens, mask, labels,
                                              tile_m=16)
    # decode-only path (labels=None) exercises the specialized kernel variant
    (pred_dec,) = bert_rnn_crf_decoder_forward(params, hiddens, mask, tile_m=16)
    jax.block_until_ready((pred, loss, pred_dec))

    # ---- self-check ------------------------------------------------------
    NTP = _round_up(max(NT, 128), 128)

    # 1) linear kernel (bf16 in, f32 acc) vs XLA f32 matmul
    h2d = hiddens.reshape(B * T, D).astype(jnp.bfloat16)
    w_pad = jnp.zeros((D, NTP), jnp.float32).at[:, :NT].set(params["w"])
    b_pad = jnp.full((1, NTP), NEG, jnp.float32).at[:, :NT].set(params["b"])
    logits_k = linear_pallas(h2d, w_pad.astype(jnp.bfloat16), b_pad,
                             tile_m=16).reshape(B, T, NTP)[:, :, :NT]
    logits_x = jnp.einsum("btd,dn->btn", hiddens, params["w"]) + params["b"]
    assert jnp.allclose(logits_k, logits_x, rtol=2e-2, atol=2e-2), "linear mismatch"

    # 2) CRF kernel vs pure-JAX reference on the *same* (kernel) logits
    ref_tags, ref_llh = _crf_reference(
        logits_k, mask, labels,
        params["start"], params["end"], params["trans"])
    ref_loss = -jnp.mean(ref_llh)
    assert jnp.array_equal(pred, ref_tags), "viterbi tags mismatch"
    assert jnp.array_equal(pred_dec, ref_tags), "decode-only tags mismatch"
    assert jnp.allclose(loss, ref_loss, rtol=5e-3, atol=5e-3), "loss mismatch"

    print("KERNEL_OK")
</pallas_src>

<mosaic_0001>
module attributes {stable_mosaic.version = 11 : i64} {
  func.func @linear_kernel(%arg0: i32, %arg1: memref<16x32xbf16, #tpu.memory_space<vmem>>, %arg2: memref<32x128xbf16, #tpu.memory_space<vmem>>, %arg3: memref<1x128xf32, #tpu.memory_space<vmem>>, %arg4: memref<16x128xf32, #tpu.memory_space<vmem>>) attributes {dimension_semantics = [#tpu.dimension_semantics<parallel>], iteration_bounds = array<i64: 2>, scalar_prefetch = 0 : i64, scratch_operands = 0 : i64, tpu.core_type = #tpu.core_type<tc>, window_params = [{transform_indices = @transform_0, window_bounds = array<i64: 16, 32>}, {pipeline_mode = #tpu.pipeline_mode<synchronous>, transform_indices = @transform_1, window_bounds = array<i64: 32, 128>}, {pipeline_mode = #tpu.pipeline_mode<synchronous>, transform_indices = @transform_2, window_bounds = array<i64: 1, 128>}, {transform_indices = @transform_3, window_bounds = array<i64: 16, 128>}]} {
    %c0 = arith.constant 0 : index
    %c0_0 = arith.constant 0 : index
    %0 = vector.load %arg1[%c0, %c0_0] : memref<16x32xbf16, #tpu.memory_space<vmem>>, vector<16x32xbf16>
    %c0_1 = arith.constant 0 : index
    %c0_2 = arith.constant 0 : index
    %1 = vector.load %arg2[%c0_1, %c0_2] : memref<32x128xbf16, #tpu.memory_space<vmem>>, vector<32x128xbf16>
    %cst = arith.constant dense<0.000000e+00> : vector<16x128xf32>
    %2 = tpu.matmul %0, %1, %cst {dimension_numbers = #tpu.dot_dimension_numbers<[1], [0], [0], [1], [0, 0, 1, 1], [], []>} : vector<16x32xbf16>, vector<32x128xbf16>, vector<16x128xf32> -> vector<16x128xf32>
    %c0_3 = arith.constant 0 : index
    %c0_4 = arith.constant 0 : index
    %3 = vector.load %arg3[%c0_3, %c0_4] : memref<1x128xf32, #tpu.memory_space<vmem>>, vector<1x128xf32>
    %4 = vector.broadcast %3 : vector<1x128xf32> to vector<16x128xf32>
    %5 = arith.addf %2, %4 : vector<16x128xf32>
    %c0_5 = arith.constant 0 : index
    %c0_6 = arith.constant 0 : index
    %6 = vector.load %arg4[%c0_5, %c0_6] : memref<16x128xf32, #tpu.memory_space<vmem>>, vector<16x128xf32>
    tpu.vector_store %arg4[%c0_5, %c0_6], %5 {strides = array<i32>} : memref<16x128xf32, #tpu.memory_space<vmem>>, vector<16x128xf32>,
    return
  }
  func.func @transform_0(%arg0: i32) -> (i32, i32) {
    %c0_i32 = arith.constant 0 : i32
    %c0_i32_0 = arith.constant 0 : i32
    return %arg0, %c0_i32 : i32, i32
  }
  func.func @transform_1(%arg0: i32) -> (i32, i32) {
    %c0_i32 = arith.constant 0 : i32
    %c0_i32_0 = arith.constant 0 : i32
    %c0_i32_1 = arith.constant 0 : i32
    return %c0_i32, %c0_i32_0 : i32, i32
  }
  func.func @transform_2(%arg0: i32) -> (i32, i32) {
    %c0_i32 = arith.constant 0 : i32
    %c0_i32_0 = arith.constant 0 : i32
    %c0_i32_1 = arith.constant 0 : i32
    return %c0_i32, %c0_i32_0 : i32, i32
  }
  func.func @transform_3(%arg0: i32) -> (i32, i32) {
    %c0_i32 = arith.constant 0 : i32
    %c0_i32_0 = arith.constant 0 : i32
    return %arg0, %c0_i32 : i32, i32
  }
}

</mosaic_0001>

<bundles_post_ra>
// kernel: tpu_custom_call.1
= control target key start
LH: loop header
LB: loop body
LE: loop exit
PB: predicated region body
PF: predicated region fallthrough
CT: control target
= control target key end

     0   :  { %8 = vsyncpa [#allocation3], 0  ;;  %s851_s0 = inlined_call_operand.hbm [shape: bf16[32,32], index: 0, kind: input, shape index: {}]   ;;  %s852_s1 = inlined_call_operand.hbm [shape: bf16[32,128], index: 1, kind: input, shape index: {}]   ;;  %s853_s2 = inlined_call_operand.vmem [shape: f32[1,128], index: 2, kind: input, shape index: {}]   ;;  %s854_s3 = inlined_call_operand.hbm [shape: f32[32,128], index: 3, kind: output, shape index: {}]  }
   0x1   :  { %10 = vsyncpa [#allocation3 + $0x1], 0 }
   0x2   :  { %11 = vsyncpa [#allocation6], 0 }
   0x3   :  { %12 = vsyncpa [#allocation4], 0 }
   0x4   :  { %14 = vsyncpa [#allocation4 + $0x1], 0  ;;  %s640_s12 = smov 0   ;;  %s642_s13 = smov 0  }
   0x5   :  { %s644_s14 = smov 0   ;;  %s646_s15 = smov 0  }
   0x6 LB: > { %s661_s16 = sadd.s32 4294967295, %s609_s15   ;;  %s381_s17 = sadd.s32 4294967294, %s609_s15   ;;  %s609_s15 = sphi %s646_s15, %s874_s15   ;;  %s605_s14 = sphi %s644_s14, %s873_s14   ;;  %s601_s13 = sphi %s642_s13, %s872_s13   ;;  %s597_s12 = sphi %s640_s12, %s871_s12  }
   0x7   : > { %p40_p0 = scmp.ne.s32.totalorder %s601_s13, %s597_s12  ;;  %p855_p1 = scmp.eq.s32.totalorder %s661_s16, 0 }
   0x8   : > { %p112_p3 = scmp.eq.s32.totalorder %s381_s17, 1  ;;  %p382_p5 = scmp.ge.s32.totalorder %s609_s15, 1 }
   0x9   : > { %p670_p4 = por %p855_p1, %p40_p0  ;;  %p119_p7 = scmp.lt.s32.totalorder %s609_s15, 3 }
   0xa   : > { %p675_p6 = por %p112_p3, %p40_p0  ;;  %s611_s21 = smov [#allocation5]  }
   0xb   : > { %s858_s18 = scalar_select %p670_p4, 1, 0 }
   0xc   : > { %s859_s19 = scalar_select %p675_p6, 1, 0 }
   0xd   : > { %p680_p8 = pnand %p382_p5, %p119_p7  ;;  %s131_s22 = sshll.u32 %s611_s21, 4  ;;  %s684_s22 = int_to_ptr.vmem [resolvable:$true] %s131_s22 }
   0xe   : > { %s696_s24 = sadd.s32 1, %s609_s15   ;;  %s27_s25 = sadd.s32 1, %s605_s14 }
   0xf   : > { %s860_s20 = scalar_select %p680_p8, 1, 0 }
  0x10   : > { %p423_p9 = pneg %p680_p8  ;;  %s24_s26 = ssub.s32 %s609_s15, %s696_s24 }
  0x11   : > { %s481_s29 = scalar_lea.hbm %s852_s1, 256 }
  0x12   : > { %p691_p11 = pnand %p423_p9, %p855_p1  ;;  %p482_p12 = scmp.ne.s32.totalorder %s852_s1, %s481_s29 }
  0x13   : > { %p488_p5 = scmp.lt.u32.totalorder %s481_s29, %s852_s1 }
  0x14   : > { %p483_p13 = pneg %p691_p11 }
  0x16   : > { %p484_p0 = pnand %p483_p13, %p482_p12 }
  0x18   : > { %p485_p3 = pneg %p484_p0 }
  0x1a   : > { %p490_p7 = pnand %p488_p5, %p485_p3 }
  0x1c   : > { %493 = shalt.err (!%p490_p7)
}
  0x1d   : > { %s494_s7 = scalar_lea.vmem %s684_s22, 256  ;;  %p502_p2 = scmp.lt.s32.totalorder %s684_s22, %s684_s22 }
  0x1e   : > { %p495_p9 = scmp.ne.s32.totalorder %s684_s22, %s494_s7  ;;  %p503_p6 = scmp.lt.s32.totalorder %s494_s7, %s494_s7 }
  0x20   : > { %p497_p10 = pnand %p495_p9, %p483_p13  ;;  %p504_p4 = por %p503_p6, %p502_p2 }
  0x22   : > { %p498_p1 = pneg %p497_p10 }
  0x24   : > { %p505_p8 = pnand %p504_p4, %p498_p1 }
  0x26   : > { %508 = shalt.err (!%p505_p8)
}
  0x27   : > { %s612_s8 = smov 64   ;;  %s613_s9 = smov 4  }
  0x28   : > { %426 = dma.hbm_to_vmem [thread:$0]  (!%p691_p11), %s852_s1, 256, %s684_s22, [#allocation6], %s612_s8, %s612_s8, %s613_s9  }
  0x29   : > { %p25_p1 = scmp.eq.s32.totalorder %s24_s26, 0  ;;  %p34_p2 = scmp.ne.s32.totalorder %s605_s14, %s601_s13 }
  0x2a   : > { %p35_p4 = scmp.eq.s32.totalorder %s609_s15, 0  ;;  %p436_p6 = scmp.lt.s32.totalorder %s609_s15, 2 }
  0x2b   : > { %s730_s17 = scalar_select %p25_p1, %s605_s14, %s27_s25  }
  0x2c   : > { %p36_p8 = por %p35_p4, %p34_p2  ;;  %p862_p10 = scmp.eq.s32.totalorder %s661_s16, 1 }
  0x2d   : > { %s148_s23 = sand.u32 1, %s605_s14   ;;  %s402_s27 = sshll.u32 %s609_s15, 7 }
  0x2e   : > { %p734_p12 = por %p862_p10, %p34_p2  ;;  %s385_s28 = sshll.u32 %s148_s23, 3 }
  0x2f   : > { %s743_s4 = scalar_lea.hbm %s851_s0, %s402_s27  ;;  %s152_s22 = scalar_lea.vmem [#allocation2], %s385_s28 }
  0x30   : > { %s159_s25 = sshll.u32 %s152_s22, 4  ;;  %p745_p11 = pnand %p436_p6, %p36_p8  ;;  %s749_s25 = int_to_ptr.vmem [resolvable:$true] %s159_s25 }
  0x31   : > { %s751_s5 = scalar_lea.sflag [#allocation3], %s148_s23  ;;  %s509_s6 = scalar_lea.hbm %s743_s4, 128 }
  0x32   : > { %p510_p13 = scmp.ne.s32.totalorder %s743_s4, %s509_s6  ;;  %p511_p0 = pneg %p745_p11 }
  0x33   : > { %s514_s11 = scalar_lea.hbm %s851_s0, 256  ;;  %p515_p7 = scmp.lt.u32.totalorder %s743_s4, %s851_s0 }
  0x34   : > { %p512_p3 = pnand %p511_p0, %p510_p13  ;;  %p516_p9 = scmp.lt.u32.totalorder %s514_s11, %s509_s6 }
  0x35   : > { %p518_p2 = scmp.lt.u32.totalorder %s509_s6, %s743_s4 }
  0x36   : > { %p513_p5 = pneg %p512_p3  ;;  %p517_p1 = por %p516_p9, %p515_p7 }
  0x38   : > { %p519_p4 = por %p518_p2, %p517_p1 }
  0x3a   : > { %p520_p6 = pnand %p519_p4, %p513_p5 }
  0x3c   : > { %523 = shalt.err (!%p520_p6)
}
  0x3d   : > { %s524_s23 = scalar_lea.vmem %s749_s25, 128  ;;  %s614_s29 = smov [#allocation2]  }
  0x3e   : > { %p525_p8 = scmp.ne.s32.totalorder %s749_s25, %s524_s23  ;;  %s529_s30 = sshll.u32 %s614_s29, 4  ;;  %s530_s30 = int_to_ptr.vmem [resolvable:$false] %s529_s30 }
  0x3f   : > { %s531_s22 = scalar_lea.vmem %s530_s30, 256  ;;  %p532_p3 = scmp.lt.s32.totalorder %s749_s25, %s530_s30 }
  0x40   : > { %p527_p10 = pnand %p525_p8, %p511_p0  ;;  %p533_p7 = scmp.lt.s32.totalorder %s531_s22, %s524_s23 }
  0x42   : > { %p528_p13 = pneg %p527_p10  ;;  %p534_p9 = por %p533_p7, %p532_p3 }
  0x44   : > { %p535_p1 = pnand %p534_p9, %p528_p13 }
  0x46   : > { %538 = shalt.err (!%p535_p1)
}
  0x47   : > { %430 = dma.hbm_to_vmem [thread:$0]  (!%p745_p11), %s743_s4, 128, %s749_s25, %s751_s5, %s612_s8, %s612_s8, %s613_s9  }
  0x48   : > { %p865_p0 = scmp.ne.s32.totalorder %s860_s20, 0 }
  0x49   : > { %s785_s6 = sand.u32 (!%p865_p0), 1, %s601_s13   ;;  %p866_p5 = scmp.ne.s32.totalorder (!%p865_p0), %s858_s18, 0 }
  0x4a   : > { %171 = sbr.rel (%p865_p0) target bundleno = 325 (0x145), region = 32  ;;  %s389_s7 = sshll.u32 (!%p865_p0), %s785_s6, 3 }
  0x4b   : > { %s174_s10 = scalar_lea.sflag (!%p865_p0), [#allocation3], %s785_s6  ;;  %s177_s11 = scalar_lea.vmem (!%p865_p0), [#allocation2], %s389_s7 }
  0x51   : > { %584 = dma.done.wait (%p866_p5), %s174_s10, 128  }
  0x52   : > { %586 = vsyncadd (%p866_p5), %s174_s10, 4294967168  ;;  %p867_p2 = scmp.eq.s32.totalorder %s661_s16, 0 }
  0x54   : > { %588 = dma.done.wait (%p867_p2), [#allocation6], 256   ;;  %p868_p11 = pmov %p867_p2 }
  0x55   : > { %v615_v0 = vmov 0.0   ;;  %vm616_vm0 = vmmov 0   ;;  %v478_v1 = vld [vmem:[#allocation5] sm:$0xff]   ;;  %v479_v2 = vld [vmem:[#allocation5 + $0x8] sm:$0xff]   ;;  %v480_v3 = vld [vmem:[%s177_s11] sm:$0xff]   ;;  %vm237_vm1 = vcmask 261120  }
  0x56   : > { %590 = vsyncadd (%p868_p11), [#allocation6], 4294967040  ;;  %407 = vmatprep.subr.bf16.mxu0 %v615_v0  ;;  %411 = vmatprep.mubr.msk.bf16.mxu0 %vm616_vm0, %v615_v0  ;;  %s391_s18 = sshll.u32 %s785_s6, 4  ;;  %v392_v4 = vld [vmem:[%s853_s2] ss:$0 sm:$0xff]  ;;  %s403_s25 = sshll.u32 %s661_s16, 8 }
  0x57   : > { %408 = vmatpush3.bf16.msra.mxu0 %v478_v1  ;;  %s203_s9 = scalar_lea.vmem [#allocation7], %s391_s18  ;;  %s807_s27 = scalar_lea.hbm %s854_s3, %s403_s25 }
  0x58   : > { %409 = vmatprep.subr.bf16.mxu0 %v615_v0  ;;  %s298_s4 = sshll.u32 %s203_s9, 4  ;;  %s285_s28 = scalar_lea.sflag [#allocation4], %s785_s6  ;;  %s802_s4 = int_to_ptr.vmem [resolvable:$true] %s298_s4 }
  0x59   : > { %s539_s16 = scalar_lea.vmem %s802_s4, 256  ;;  %s617_s23 = smov [#allocation7]  }
  0x5a   : > { %p540_p4 = scmp.ne.s32.totalorder %s802_s4, %s539_s16  ;;  %s543_s29 = sshll.u32 %s617_s23, 4  ;;  %s544_s29 = int_to_ptr.vmem [resolvable:$false] %s543_s29 }
  0x5b   : > { %410 = vmatpush3.bf16.msra.mxu0 %v479_v2  ;;  %s545_s30 = scalar_lea.vmem %s544_s29, 512  ;;  %p546_p10 = scmp.lt.s32.totalorder %s802_s4, %s544_s29 }
  0x5c   : > { %p541_p6 = pnand %p540_p4, %p734_p12  ;;  %p547_p13 = scmp.lt.s32.totalorder %s545_s30, %s539_s16 }
  0x5e   : > { %412 = vmatmul.mubr.msk.bf16.vlgmr.msra.gmra.mrb[0].mxu0 %vm237_vm1, %v480_v3  ;;  %p542_p8 = pneg %p541_p6  ;;  %p548_p3 = por %p547_p13, %p546_p10 }
  0x60   : > { %p549_p7 = pnand %p548_p3, %p542_p8 }
 0x131   : > { %v275_v5 = vpop.f32.mrb[0].mxu0 }
 0x132   : > { %v276_v6 = vadd.f32 %v392_v4, %v275_v5  ;;  %v413_v7 = vpop.f32.mrb[1].mxu0 }
 0x133   : > { %v278_v8 = vpop.f32.mrb[2].mxu0 }
 0x134   : > { %282 = vst [vmem:[%s203_s9] sm:$0xff] %v276_v6  ;;  %v279_v9 = vadd.f32 %v392_v4, %v278_v8  ;;  %v414_v10 = vpop.f32.mrb[3].mxu0 }
 0x136   : > { %283 = vst [vmem:[%s203_s9 + $0x8] sm:$0xff] %v279_v9 }
 0x137   : > { %552 = shalt.err (!%p549_p7)
}
 0x138   : > { %s553_s22 = scalar_lea.hbm %s807_s27, 256  ;;  %s557_s11 = scalar_lea.hbm %s854_s3, 512 }
 0x139   : > { %p554_p9 = scmp.ne.s32.totalorder %s807_s27, %s553_s22  ;;  %p558_p5 = scmp.lt.u32.totalorder %s807_s27, %s854_s3 }
 0x13a   : > { %p559_p2 = scmp.lt.u32.totalorder %s557_s11, %s553_s22  ;;  %p561_p4 = scmp.lt.u32.totalorder %s553_s22, %s807_s27 }
 0x13b   : > { %p555_p1 = pnand %p554_p9, %p734_p12 }
 0x13c   : > { %p560_p11 = por %p559_p2, %p558_p5 }
 0x13d   : > { %p556_p0 = pneg %p555_p1 }
 0x13e   : > { %p562_p6 = por %p561_p4, %p560_p11 }
 0x140   : > { %p563_p8 = pnand %p562_p6, %p556_p0 }
 0x142   : > { %566 = shalt.err (!%p563_p8)
}
 0x143   : > { %s618_s8 = smov 128   ;;  %s619_s9 = smov 8  }
 0x144   : > { %421 = dma.vmem_to_hbm [thread:$0]  (%p734_p12), %s802_s4, 256, %s807_s27, %s285_s28, %s618_s8, %s618_s8, %s619_s9  }
 0x145 PF: > { %s313_s25 = sand.u32 1, %s597_s12   ;;  %p869_p10 = scmp.ne.s32.totalorder %s859_s19, 0 }
 0x146   : > { %p870_p13 = scmp.ge.s32.totalorder %s609_s15, 2  ;;  %s314_s26 = scalar_lea.sflag [#allocation4], %s313_s25 }
 0x148   : > { %p432_p3 = pnand %p870_p13, %p869_p10 }
 0x14a   : > { %592 = dma.done.wait (!%p432_p3), %s314_s26, 256  }
 0x14b   : > { %594 = vsyncadd (!%p432_p3), %s314_s26, 4294967040  ;;  %p17_p7 = scmp.ge.s32.totalorder %s696_s24, 4   ;;  %s871_s12 = smov %s601_s13 }
 0x14c   : > { %s872_s13 = smov %s605_s14  ;;  %s873_s14 = smov %s730_s17 }
 0x14d   : > { %s874_s15 = smov %s696_s24  ;;  %19 = sbr.rel (!%p17_p7) target bundleno = 6 (0x6), region = 81 }
 0x154   :  { %319 = vsyncpa [#allocation3], 1 }
 0x155   :  { %321 = vsyncpa [#allocation3 + $0x1], 1 }
 0x156   :  { %322 = vsyncpa [#allocation6], 1 }
 0x157   :  { %323 = vsyncpa [#allocation4], 1 }
 0x158   :  { %325 = vsyncpa [#allocation4 + $0x1], 1 }

</bundles_post_ra>
